<compile_context>
chip_gen: v5e
topology: v5e:2x2
jax: 0.10.0
libtpu: 0.0.40
codegen_flags: <defaults>
</compile_context>

<pallas_src>
import functools

import jax
import jax.numpy as jnp
from jax.experimental import pallas as pl
from jax.experimental.pallas import tpu as pltpu

_MIB = 1024 * 1024


def _ffn_kernel(x_ref, w1_ref, b1_ref, w2_ref, b2_ref, o_ref, acc_ref):
    """Grid = (M tiles, H tiles). H is the reduction ("arbitrary") axis."""
    j = pl.program_id(1)
    nj = pl.num_programs(1)

    # First matmul on the (C -> th) weight slab, f32 accumulation on the MXU.
    x = x_ref[...]                                      # (tm, C), input dtype
    h = jnp.dot(x, w1_ref[...], preferred_element_type=jnp.float32)
    h = jnp.maximum(h + b1_ref[...], 0.0)               # bias + ReLU (f32)

    # Second matmul: cast hidden back to weight dtype (bf16) for MXU peak,
    # keep the partial product in f32.
    part = jnp.dot(
        h.astype(w2_ref.dtype), w2_ref[...], preferred_element_type=jnp.float32
    )

    # Init accumulator with the output bias (folds the b2 add into init).
    @pl.when(j == 0)
    def _():
        acc_ref[...] = jnp.broadcast_to(b2_ref[...], acc_ref.shape)

    # Intermediate hidden tiles: accumulate.
    @pl.when(j < nj - 1)
    def _():
        acc_ref[...] += part

    # Last hidden tile: fuse the final accumulate into the output write
    # (saves one (tm, C) f32 acc store + reload per M tile).
    @pl.when(j == nj - 1)
    def _():
        o_ref[...] = (acc_ref[...] + part).astype(o_ref.dtype)


def _round_up(x, m):
    return (x + m - 1) // m * m


def _divisors_desc(n):
    small = [d for d in range(1, int(n ** 0.5) + 1) if n % d == 0]
    return sorted({d for x in small for d in (x, n // x)}, reverse=True)


def _vmem_bytes(tm, th, c, itemsize):
    """Estimated VMEM footprint, incl. double buffers and the hidden temp."""
    db = 2  # BlockSpec double-buffering
    x_b = db * tm * c * itemsize
    w1_b = db * c * th * itemsize
    w2_b = db * th * c * itemsize
    out_b = db * tm * c * itemsize
    acc_b = tm * c * 4                     # f32 accumulator scratch
    h_b = tm * th * (4 + itemsize)         # f32 dot result + bf16 cast copy
    misc = db * (th + c) * 4               # biases
    return x_b + w1_b + w2_b + out_b + acc_b + h_b + misc


def _pick_th(H, tm, c, itemsize, budget):
    """Largest divisor of H that is lane-friendly and fits the VMEM budget."""
    divs = _divisors_desc(H)
    for mult in (256, 128):
        for d in divs:
            if d % mult == 0 and _vmem_bytes(tm, d, c, itemsize) <= budget:
                return d
    return None


def _vmem_capacity_bytes():
    try:
        return int(pltpu.get_tpu_info().vmem_capacity_bytes)
    except Exception:
        return 64 * _MIB  # conservative (v7x-sized) fallback


def _select_tiles(M, C, H, itemsize):
    capacity = _vmem_capacity_bytes()
    budget = int(capacity * 0.75)

    # 128 MiB chips (v5e/v6e): big tm makes weight streaming compute-bound.
    # 64 MiB chips (v7x): 3.2 TB/s HBM -> tm ~512 is already compute-bound.
    tm_target = 1024 if capacity >= 96 * _MIB else 512
    tm = max(16, min(tm_target, _round_up(M, 16)))

    th = _pick_th(H, tm, C, itemsize, budget)
    while th is None and tm > 64:
        tm = max(64, tm // 2)
        th = _pick_th(H, tm, C, itemsize, budget)
    if th is None:
        # Last resort: smallest lane-friendly divisor (or full H).
        cands = [d for d in _divisors_desc(H) if d % 128 == 0]
        th = min(cands) if cands else H
    return tm, th, budget


@functools.partial(jax.jit, static_argnames=("tm", "th", "vmem_limit"))
def _feed_forward_impl(x, w1, b1_2d, w2, b2_2d, *, tm, th, vmem_limit):
    B, T, C = x.shape
    H = w1.shape[1]
    M = B * T

    m_pad = _round_up(M, tm)
    x2d = x.reshape(M, C)
    if m_pad != M:
        x2d = jnp.pad(x2d, ((0, m_pad - M), (0, 0)))

    out2d = pl.pallas_call(
        _ffn_kernel,
        out_shape=jax.ShapeDtypeStruct((m_pad, C), x.dtype),
        grid=(m_pad // tm, H // th),
        in_specs=[
            pl.BlockSpec((tm, C), lambda i, j: (i, 0)),   # x tile (per i)
            pl.BlockSpec((C, th), lambda i, j: (0, j)),   # W1 slab (per j)
            pl.BlockSpec((1, th), lambda i, j: (0, j)),   # b1 slice (per j)
            pl.BlockSpec((th, C), lambda i, j: (j, 0)),   # W2 slab (per j)
            pl.BlockSpec((1, C), lambda i, j: (0, 0)),    # b2 (constant)
        ],
        out_specs=pl.BlockSpec((tm, C), lambda i, j: (i, 0)),
        scratch_shapes=[pltpu.VMEM((tm, C), jnp.float32)],  # f32 accumulator
        compiler_params=pltpu.CompilerParams(
            dimension_semantics=("parallel", "arbitrary"),
            vmem_limit_bytes=vmem_limit,
        ),
    )(x2d, w1, b1_2d, w2, b2_2d)

    return out2d[:M].reshape(B, T, C)


def feed_forward(x, w1, b1, w2, b2, *, tm=None, th=None):
    """x: (B, T, C); w1: (C, H); b1: (H,); w2: (H, C); b2: (C,).  H = 4*C."""
    B, T, C = x.shape
    H = w1.shape[1]
    M = B * T
    itemsize = jnp.dtype(x.dtype).itemsize

    auto_tm, auto_th, budget = _select_tiles(M, C, H, itemsize)
    if tm is None:
        tm = auto_tm
    else:
        tm = max(16, min(tm, _round_up(M, 16)))  # clamp explicit tm for small M
    if th is None:
        th = auto_th
    assert H % th == 0, f"H={H} must be divisible by th={th}"
    assert th % 128 == 0 or th == H, f"th={th} must be lane-friendly"

    # Biases stay in f32 (added on the VPU, not the MXU).
    b1_2d = b1.reshape(1, H).astype(jnp.float32)
    b2_2d = b2.reshape(1, C).astype(jnp.float32)

    return _feed_forward_impl(
        x, w1, b1_2d, w2, b2_2d, tm=tm, th=th, vmem_limit=budget
    )


def init_params(key, n_embd):
    """Deterministic init mirroring nn.Linear default (uniform +/- 1/sqrt(fan_in))."""
    h = 4 * n_embd
    k1, k2, k3, k4 = jax.random.split(key, 4)
    lim1 = 1.0 / (n_embd ** 0.5)
    lim2 = 1.0 / (h ** 0.5)
    w1 = jax.random.uniform(k1, (n_embd, h), jnp.float32, -lim1, lim1)
    b1 = jax.random.uniform(k2, (h,), jnp.float32, -lim1, lim1)
    w2 = jax.random.uniform(k3, (h, n_embd), jnp.float32, -lim2, lim2)
    b2 = jax.random.uniform(k4, (n_embd,), jnp.float32, -lim2, lim2)
    return w1, b1, w2, b2


if __name__ == "__main__":
    n_embd = 128      # GPTConfig.n_embd
    B, T = 2, 8       # small batch / sequence; M = 16 (tm clamps to 16)

    key = jax.random.PRNGKey(0)
    kx, kp = jax.random.split(key)
    x = jax.random.normal(kx, (B, T, n_embd), jnp.float32)
    w1, b1, w2, b2 = init_params(kp, n_embd)

    # bf16 inputs/weights for MXU-peak matmuls; f32 biases and accumulation.
    xb = x.astype(jnp.bfloat16)
    w1b = w1.astype(jnp.bfloat16)
    w2b = w2.astype(jnp.bfloat16)

    # Pure-JAX reference following the same bf16-in / f32-accumulate path
    # (eval-mode dropout = identity).
    xr = xb.astype(jnp.float32)
    w1r = w1b.astype(jnp.float32)
    w2r = w2b.astype(jnp.float32)
    h_ref = jnp.maximum(xr.reshape(-1, n_embd) @ w1r + b1, 0.0)
    h_ref = h_ref.astype(jnp.bfloat16).astype(jnp.float32)
    ref = (h_ref @ w2r + b2).reshape(B, T, n_embd)

    # 1) Auto-selected tiles (single hidden tile path at this size).
    y_auto = feed_forward(xb, w1b, b1, w2b, b2)
    jax.block_until_ready(y_auto)
    assert y_auto.shape == (B, T, n_embd)
    assert y_auto.dtype == jnp.bfloat16
    assert jnp.allclose(y_auto.astype(jnp.float32), ref, atol=2e-2, rtol=2e-2)

    # 2) th=256 -> two hidden tiles, exercising the accumulator / reduction path.
    y = feed_forward(xb, w1b, b1, w2b, b2, th=256)
    jax.block_until_ready(y)
    assert y.shape == (B, T, n_embd)
    assert y.dtype == jnp.bfloat16
    assert jnp.allclose(y.astype(jnp.float32), ref, atol=2e-2, rtol=2e-2)

    print("KERNEL_OK")
</pallas_src>

<mosaic_0001>
module attributes {stable_mosaic.version = 11 : i64} {
  func.func @_ffn_kernel(%arg0: i32, %arg1: i32, %arg2: memref<16x128xbf16, #tpu.memory_space<vmem>>, %arg3: memref<128x512xbf16, #tpu.memory_space<vmem>>, %arg4: memref<1x512xf32, #tpu.memory_space<vmem>>, %arg5: memref<512x128xbf16, #tpu.memory_space<vmem>>, %arg6: memref<1x128xf32, #tpu.memory_space<vmem>>, %arg7: memref<16x128xbf16, #tpu.memory_space<vmem>>, %arg8: memref<16x128xf32, #tpu.memory_space<vmem>>) attributes {dimension_semantics = [#tpu.dimension_semantics<parallel>, #tpu.dimension_semantics<arbitrary>], iteration_bounds = array<i64: 1, 1>, scalar_prefetch = 0 : i64, scratch_operands = 1 : i64, tpu.core_type = #tpu.core_type<tc>, window_params = [{transform_indices = @transform_0, window_bounds = array<i64: 16, 128>}, {transform_indices = @transform_1, window_bounds = array<i64: 128, 512>}, {transform_indices = @transform_2, window_bounds = array<i64: 1, 512>}, {transform_indices = @transform_3, window_bounds = array<i64: 512, 128>}, {pipeline_mode = #tpu.pipeline_mode<synchronous>, transform_indices = @transform_4, window_bounds = array<i64: 1, 128>}, {transform_indices = @transform_5, window_bounds = array<i64: 16, 128>}]} {
    %c0 = arith.constant 0 : index
    %c0_0 = arith.constant 0 : index
    %0 = vector.load %arg2[%c0, %c0_0] : memref<16x128xbf16, #tpu.memory_space<vmem>>, vector<16x128xbf16>
    %c0_1 = arith.constant 0 : index
    %c0_2 = arith.constant 0 : index
    %1 = vector.load %arg3[%c0_1, %c0_2] : memref<128x512xbf16, #tpu.memory_space<vmem>>, vector<128x512xbf16>
    %cst = arith.constant dense<0.000000e+00> : vector<16x512xf32>
    %2 = tpu.matmul %0, %1, %cst {dimension_numbers = #tpu.dot_dimension_numbers<[1], [0], [0], [1], [0, 0, 1, 1], [], []>} : vector<16x128xbf16>, vector<128x512xbf16>, vector<16x512xf32> -> vector<16x512xf32>
    %c0_3 = arith.constant 0 : index
    %c0_4 = arith.constant 0 : index
    %3 = vector.load %arg4[%c0_3, %c0_4] : memref<1x512xf32, #tpu.memory_space<vmem>>, vector<1x512xf32>
    %4 = vector.broadcast %3 : vector<1x512xf32> to vector<16x512xf32>
    %5 = arith.addf %2, %4 : vector<16x512xf32>
    %cst_5 = arith.constant 0.000000e+00 : f32
    %6 = vector.broadcast %cst_5 : f32 to vector<16x512xf32>
    %7 = arith.maximumf %5, %6 : vector<16x512xf32>
    %8 = arith.truncf %7 : vector<16x512xf32> to vector<16x512xbf16>
    %c0_6 = arith.constant 0 : index
    %c0_7 = arith.constant 0 : index
    %9 = vector.load %arg5[%c0_6, %c0_7] : memref<512x128xbf16, #tpu.memory_space<vmem>>, vector<512x128xbf16>
    %cst_8 = arith.constant dense<0.000000e+00> : vector<16x128xf32>
    %10 = tpu.matmul %8, %9, %cst_8 {dimension_numbers = #tpu.dot_dimension_numbers<[1], [0], [0], [1], [0, 0, 1, 1], [], []>} : vector<16x512xbf16>, vector<512x128xbf16>, vector<16x128xf32> -> vector<16x128xf32>
    %c0_i32 = arith.constant 0 : i32
    %11 = arith.cmpi eq, %arg1, %c0_i32 : i32
    %12 = arith.extui %11 : i1 to i32
    %c0_i32_9 = arith.constant 0 : i32
    %13 = arith.cmpi ne, %12, %c0_i32_9 : i32
    scf.if %13 {
      %c0_14 = arith.constant 0 : index
      %c0_15 = arith.constant 0 : index
      %20 = vector.load %arg6[%c0_14, %c0_15] : memref<1x128xf32, #tpu.memory_space<vmem>>, vector<1x128xf32>
      %21 = vector.shape_cast %20 : vector<1x128xf32> to vector<1x128xf32>
      %22 = vector.broadcast %21 : vector<1x128xf32> to vector<16x128xf32>
      %c0_16 = arith.constant 0 : index
      %c0_17 = arith.constant 0 : index
      %23 = vector.load %arg8[%c0_16, %c0_17] : memref<16x128xf32, #tpu.memory_space<vmem>>, vector<16x128xf32>
      tpu.vector_store %arg8[%c0_16, %c0_17], %22 {strides = array<i32>} : memref<16x128xf32, #tpu.memory_space<vmem>>, vector<16x128xf32>,
    } else {
    }
    %c0_i32_10 = arith.constant 0 : i32
    %14 = arith.cmpi slt, %arg1, %c0_i32_10 : i32
    %15 = arith.extui %14 : i1 to i32
    %c0_i32_11 = arith.constant 0 : i32
    %16 = arith.cmpi ne, %15, %c0_i32_11 : i32
    scf.if %16 {
      %c0_14 = arith.constant 0 : index
      %c0_15 = arith.constant 0 : index
      %20 = vector.load %arg8[%c0_14, %c0_15] : memref<16x128xf32, #tpu.memory_space<vmem>>, vector<16x128xf32>
      %21 = arith.addf %20, %10 : vector<16x128xf32>
      %c0_16 = arith.constant 0 : index
      %c0_17 = arith.constant 0 : index
      %22 = vector.load %arg8[%c0_16, %c0_17] : memref<16x128xf32, #tpu.memory_space<vmem>>, vector<16x128xf32>
      tpu.vector_store %arg8[%c0_16, %c0_17], %21 {strides = array<i32>} : memref<16x128xf32, #tpu.memory_space<vmem>>, vector<16x128xf32>,
    } else {
    }
    %c0_i32_12 = arith.constant 0 : i32
    %17 = arith.cmpi eq, %arg1, %c0_i32_12 : i32
    %18 = arith.extui %17 : i1 to i32
    %c0_i32_13 = arith.constant 0 : i32
    %19 = arith.cmpi ne, %18, %c0_i32_13 : i32
    scf.if %19 {
      %c0_14 = arith.constant 0 : index
      %c0_15 = arith.constant 0 : index
      %20 = vector.load %arg8[%c0_14, %c0_15] : memref<16x128xf32, #tpu.memory_space<vmem>>, vector<16x128xf32>
      %21 = arith.addf %20, %10 : vector<16x128xf32>
      %22 = arith.truncf %21 : vector<16x128xf32> to vector<16x128xbf16>
      %c0_16 = arith.constant 0 : index
      %c0_17 = arith.constant 0 : index
      %23 = vector.load %arg7[%c0_16, %c0_17] : memref<16x128xbf16, #tpu.memory_space<vmem>>, vector<16x128xbf16>
      tpu.vector_store %arg7[%c0_16, %c0_17], %22 {strides = array<i32>} : memref<16x128xbf16, #tpu.memory_space<vmem>>, vector<16x128xbf16>,
    } else {
    }
    return
  }
  func.func @transform_0(%arg0: i32, %arg1: i32) -> (i32, i32) {
    %c0_i32 = arith.constant 0 : i32
    %c0_i32_0 = arith.constant 0 : i32
    return %arg0, %c0_i32 : i32, i32
  }
  func.func @transform_1(%arg0: i32, %arg1: i32) -> (i32, i32) {
    %c0_i32 = arith.constant 0 : i32
    %c0_i32_0 = arith.constant 0 : i32
    return %c0_i32, %arg1 : i32, i32
  }
  func.func @transform_2(%arg0: i32, %arg1: i32) -> (i32, i32) {
    %c0_i32 = arith.constant 0 : i32
    %c0_i32_0 = arith.constant 0 : i32
    return %c0_i32, %arg1 : i32, i32
  }
  func.func @transform_3(%arg0: i32, %arg1: i32) -> (i32, i32) {
    %c0_i32 = arith.constant 0 : i32
    %c0_i32_0 = arith.constant 0 : i32
    return %arg1, %c0_i32 : i32, i32
  }
  func.func @transform_4(%arg0: i32, %arg1: i32) -> (i32, i32) {
    %c0_i32 = arith.constant 0 : i32
    %c0_i32_0 = arith.constant 0 : i32
    %c0_i32_1 = arith.constant 0 : i32
    return %c0_i32, %c0_i32_0 : i32, i32
  }
  func.func @transform_5(%arg0: i32, %arg1: i32) -> (i32, i32) {
    %c0_i32 = arith.constant 0 : i32
    %c0_i32_0 = arith.constant 0 : i32
    return %arg0, %c0_i32 : i32, i32
  }
}

</mosaic_0001>

<bundles_post_ra>
// kernel: _feed_forward_impl.1
= control target key start
LH: loop header
LB: loop body
LE: loop exit
PB: predicated region body
PF: predicated region fallthrough
CT: control target
= control target key end

     0   :  { %10 = vsyncpa [#allocation4], 0  ;;  %s1258_s0 = inlined_call_operand.hbm [shape: bf16[16,128], index: 0, kind: input, shape index: {}]   ;;  %s1259_s1 = inlined_call_operand.hbm [shape: bf16[128,512], index: 1, kind: input, shape index: {}]   ;;  %s1260_s2 = inlined_call_operand.hbm [shape: f32[1,512], index: 2, kind: input, shape index: {}]   ;;  %s1261_s3 = inlined_call_operand.hbm [shape: bf16[512,128], index: 3, kind: input, shape index: {}]   ;;  %s1262_s4 = inlined_call_operand.vmem [shape: f32[1,128], index: 4, kind: input, shape index: {}]   ;;  %s1263_s5 = inlined_call_operand.hbm [shape: bf16[16,128], index: 5, kind: output, shape index: {}]  }
   0x1   :  { %11 = vsyncpa [#allocation7], 0 }
   0x2   :  { %12 = vsyncpa [#allocation10], 0  ;;  %s31_s20 = sshll.u32 %s1259_s1, 4  ;;  %s32_s20 = int_to_ptr.hbm [resolvable:$true] %s31_s20 }
   0x3   :  { %13 = vsyncpa [#allocation5], 0  ;;  %s1192_s21 = smov [#allocation6]   ;;  %s18_s25 = sshll.u32 %s1258_s0, 4  ;;  %s19_s25 = int_to_ptr.hbm [resolvable:$true] %s18_s25 }
   0x4   :  { %s33_s22 = sshll.u32 %s1192_s21, 4  ;;  %s1193_s26 = smov 256   ;;  %s34_s22 = int_to_ptr.vmem [resolvable:$true] %s33_s22 }
   0x5   :  { %s1194_s27 = smov 16   ;;  %s1195_s28 = smov [#allocation3]  }
   0x6   :  { %39 = dma.hbm_to_vmem [thread:$0]  %s32_s20, 4096, %s34_s22, [#allocation7], %s1193_s26, %s1193_s26, %s1194_s27  }
   0x7   :  { %s20_s29 = sshll.u32 %s1195_s28, 4  ;;  %s1196_s30 = smov 64   ;;  %s21_s29 = int_to_ptr.vmem [resolvable:$true] %s20_s29 }
   0x8   :  { %s1197_s6 = smov 4   ;;  %s45_s8 = sshll.u32 %s1260_s2, 4  ;;  %s46_s8 = int_to_ptr.hbm [resolvable:$true] %s45_s8 }
   0x9   :  { %26 = dma.hbm_to_vmem [thread:$0]  %s19_s25, 128, %s21_s29, [#allocation4], %s1196_s30, %s1196_s30, %s1197_s6  }
   0xa   :  { %s1198_s9 = smov [#allocation8]   ;;  %s55_s12 = sshll.u32 %s1261_s3, 4  ;;  %s56_s12 = int_to_ptr.hbm [resolvable:$true] %s55_s12 }
   0xb   :  { %s47_s0 = sshll.u32 %s1198_s9, 4  ;;  %s1199_s13 = smov [#allocation9]   ;;  %s48_s0 = int_to_ptr.vmem [resolvable:$true] %s47_s0 }
   0xc   :  { %50 = dma.hbm_to_vmem [thread:$0]  %s46_s8, 64, %s48_s0, [#allocation7]  }
   0xd   :  { %s57_s14 = sshll.u32 %s1199_s13, 4  ;;  %s58_s14 = int_to_ptr.vmem [resolvable:$true] %s57_s14 }
   0xe   :  { %63 = dma.hbm_to_vmem [thread:$0]  %s56_s12, 4096, %s58_s14, [#allocation10], %s1196_s30, %s1196_s30, %s1197_s6  }
   0xf   :  { %1184 = dma.done.wait [#allocation4], 128  }
  0x10   :  { %1185 = vsyncadd [#allocation4], 4294967168 }
  0x11   :  { %1186 = dma.done.wait [#allocation7], 4160  }
  0x12   :  { %1187 = vsyncadd [#allocation7], 4294963136 }
  0x13   :  { %1188 = dma.done.wait [#allocation10], 4096  }
  0x14   :  { %1189 = vsyncadd [#allocation10], 4294963200  ;;  %v842_v0 = vld [vmem:[#allocation6 + $0xe0] sm:$0xf]  ;;  %v1015_v1 = vld [vmem:[#allocation6 + $0xec] sm:$0xf0] }
  0x15   :  { %v1013_v2 = vld [vmem:[#allocation6 + $0xe4] sm:$0xf]  ;;  %v843_v3 = vor.u32 %v1015_v1, %v842_v0  ;;  %v844_v4 = vld [vmem:[#allocation6 + $0xf0] sm:$0xf0]  ;;  %v850_v5 = vld [vmem:[#allocation6 + $0xe8] sm:$0xf] }
  0x16   :  { %v1016_v6 = vld [vmem:[#allocation6 + $0xf4] sm:$0xf0]  ;;  %v847_v7 = vor.u32 %v1013_v2, %v844_v4  ;;  %v1014_v9 = vld [vmem:[#allocation6 + $0xec] sm:$0xf]  ;;  %v852_v10 = vld [vmem:[#allocation6 + $0xf8] sm:$0xf0] }
  0x17   :  { %v851_v8 = vor.u32 %v1016_v6, %v850_v5  ;;  %v826_v11 = vld [vmem:[#allocation6 + $0xc0] sm:$0xf]  ;;  %292 = vmatpush.bf16.msra.mxu0 %v843_v3  ;;  %v855_v12 = vor.u32 %v1014_v9, %v852_v10  ;;  %v1011_v13 = vld [vmem:[#allocation6 + $0xcc] sm:$0xf0]  ;;  %v1009_v14 = vld [vmem:[#allocation6 + $0xc4] sm:$0xf] }
  0x18   :  { %v828_v15 = vld [vmem:[#allocation6 + $0xd0] sm:$0xf0]  ;;  %306 = vmatpush.bf16.msra.mxu1 %v847_v7  ;;  %v827_v16 = vor.u32 %v1011_v13, %v826_v11  ;;  %v834_v18 = vld [vmem:[#allocation6 + $0xc8] sm:$0xf]  ;;  %v1012_v19 = vld [vmem:[#allocation6 + $0xd4] sm:$0xf0] }
  0x19   :  { %320 = vmatpush.bf16.msra.mxu2 %v851_v8  ;;  %v831_v17 = vor.u32 %v1009_v14, %v828_v15  ;;  %v1010_v20 = vld [vmem:[#allocation6 + $0xcc] sm:$0xf]  ;;  %334 = vmatpush.bf16.msra.mxu3 %v855_v12  ;;  %v835_v21 = vor.u32 %v1012_v19, %v834_v18  ;;  %v836_v22 = vld [vmem:[#allocation6 + $0xd8] sm:$0xf0]  ;;  %v810_v23 = vld [vmem:[#allocation6 + $0xa0] sm:$0xf] }
  0x1a   :  { %v1007_v24 = vld [vmem:[#allocation6 + $0xac] sm:$0xf0]  ;;  %v839_v25 = vor.u32 %v1010_v20, %v836_v22  ;;  %v1005_v26 = vld [vmem:[#allocation6 + $0xa4] sm:$0xf]  ;;  %v812_v27 = vld [vmem:[#allocation6 + $0xb0] sm:$0xf0] }
  0x1b   :  { %v818_v28 = vld [vmem:[#allocation6 + $0xa8] sm:$0xf]  ;;  %293 = vmatpush.bf16.msra.mxu0 %v827_v16  ;;  %v811_v29 = vor.u32 %v1007_v24, %v810_v23  ;;  %v1008_v30 = vld [vmem:[#allocation6 + $0xb4] sm:$0xf0]  ;;  %v1006_v31 = vld [vmem:[#allocation6 + $0xac] sm:$0xf]  ;;  %v815_v33 = vor.u32 %v1005_v26, %v812_v27 }
  0x1c   :  { %v820_v32 = vld [vmem:[#allocation6 + $0xb8] sm:$0xf0]  ;;  %307 = vmatpush.bf16.msra.mxu1 %v831_v17  ;;  %v819_v34 = vor.u32 %v1008_v30, %v818_v28  ;;  %v794_v35 = vld [vmem:[#allocation6 + $0x80] sm:$0xf]  ;;  %v1003_v36 = vld [vmem:[#allocation6 + $0x8c] sm:$0xf0] }
  0x1d   :  { %321 = vmatpush.bf16.msra.mxu2 %v835_v21  ;;  %v1001_v37 = vld [vmem:[#allocation6 + $0x84] sm:$0xf]  ;;  %335 = vmatpush.bf16.msra.mxu3 %v839_v25  ;;  %v823_v38 = vor.u32 %v1006_v31, %v820_v32  ;;  %v796_v39 = vld [vmem:[#allocation6 + $0x90] sm:$0xf0]  ;;  %v802_v40 = vld [vmem:[#allocation6 + $0x88] sm:$0xf]  ;;  %v795_v44 = vor.u32 %v1003_v36, %v794_v35 }
  0x1e   :  { %v1004_v41 = vld [vmem:[#allocation6 + $0x94] sm:$0xf0]  ;;  %v1002_v42 = vld [vmem:[#allocation6 + $0x8c] sm:$0xf]  ;;  %v804_v43 = vld [vmem:[#allocation6 + $0x98] sm:$0xf0]  ;;  %v799_v45 = vor.u32 %v1001_v37, %v796_v39 }
  0x1f   :  { %294 = vmatpush.bf16.msra.mxu0 %v811_v29  ;;  %v803_v46 = vor.u32 %v1004_v41, %v802_v40  ;;  %v778_v47 = vld [vmem:[#allocation6 + $0x60] sm:$0xf]  ;;  %v999_v48 = vld [vmem:[#allocation6 + $0x6c] sm:$0xf0]  ;;  %v997_v49 = vld [vmem:[#allocation6 + $0x64] sm:$0xf]  ;;  %v807_v50 = vor.u32 %v1002_v42, %v804_v43 }
  0x20   :  { %308 = vmatpush.bf16.msra.mxu1 %v815_v33  ;;  %v780_v51 = vld [vmem:[#allocation6 + $0x70] sm:$0xf0]  ;;  %v786_v52 = vld [vmem:[#allocation6 + $0x68] sm:$0xf]  ;;  %v1000_v53 = vld [vmem:[#allocation6 + $0x74] sm:$0xf0]  ;;  %v779_v56 = vor.u32 %v999_v48, %v778_v47 }
  0x21   :  { %322 = vmatpush.bf16.msra.mxu2 %v819_v34  ;;  %336 = vmatpush.bf16.msra.mxu3 %v823_v38  ;;  %v998_v54 = vld [vmem:[#allocation6 + $0x6c] sm:$0xf]  ;;  %v788_v55 = vld [vmem:[#allocation6 + $0x78] sm:$0xf0]  ;;  %v783_v57 = vor.u32 %v997_v49, %v780_v51  ;;  %v787_v58 = vor.u32 %v1000_v53, %v786_v52  ;;  %v762_v59 = vld [vmem:[#allocation6 + $0x40] sm:$0xf] }
  0x22   :  { %v995_v60 = vld [vmem:[#allocation6 + $0x4c] sm:$0xf0]  ;;  %v993_v61 = vld [vmem:[#allocation6 + $0x44] sm:$0xf]  ;;  %v791_v62 = vor.u32 %v998_v54, %v788_v55  ;;  %v764_v63 = vld [vmem:[#allocation6 + $0x50] sm:$0xf0] }
  0x23   :  { %295 = vmatpush.bf16.msra.mxu0 %v795_v44  ;;  %v770_v0 = vld [vmem:[#allocation6 + $0x48] sm:$0xf]  ;;  %v996_v1 = vld [vmem:[#allocation6 + $0x54] sm:$0xf0]  ;;  %v994_v2 = vld [vmem:[#allocation6 + $0x4c] sm:$0xf]  ;;  %v763_v4 = vor.u32 %v995_v60, %v762_v59  ;;  %v767_v5 = vor.u32 %v993_v61, %v764_v63 }
  0x24   :  { %309 = vmatpush.bf16.msra.mxu1 %v799_v45  ;;  %v772_v3 = vld [vmem:[#allocation6 + $0x58] sm:$0xf0]  ;;  %v771_v6 = vor.u32 %v996_v1, %v770_v0  ;;  %v746_v7 = vld [vmem:[#allocation6 + $0x20] sm:$0xf]  ;;  %v991_v8 = vld [vmem:[#allocation6 + $0x2c] sm:$0xf0] }
  0x25   :  { %323 = vmatpush.bf16.msra.mxu2 %v803_v46  ;;  %337 = vmatpush.bf16.msra.mxu3 %v807_v50  ;;  %v989_v9 = vld [vmem:[#allocation6 + $0x24] sm:$0xf]  ;;  %v775_v10 = vor.u32 %v994_v2, %v772_v3  ;;  %v748_v11 = vld [vmem:[#allocation6 + $0x30] sm:$0xf0]  ;;  %v754_v12 = vld [vmem:[#allocation6 + $0x28] sm:$0xf]  ;;  %v747_v16 = vor.u32 %v991_v8, %v746_v7 }
  0x26   :  { %v992_v13 = vld [vmem:[#allocation6 + $0x34] sm:$0xf0]  ;;  %v990_v14 = vld [vmem:[#allocation6 + $0x2c] sm:$0xf]  ;;  %v756_v15 = vld [vmem:[#allocation6 + $0x38] sm:$0xf0]  ;;  %v751_v17 = vor.u32 %v989_v9, %v748_v11 }
  0x27   :  { %296 = vmatpush.bf16.msra.mxu0 %v779_v56  ;;  %v755_v18 = vor.u32 %v992_v13, %v754_v12  ;;  %v730_v19 = vld [vmem:[#allocation6] sm:$0xf]  ;;  %v987_v20 = vld [vmem:[#allocation6 + $0xc] sm:$0xf0]  ;;  %v985_v21 = vld [vmem:[#allocation6 + $0x4] sm:$0xf]  ;;  %v759_v22 = vor.u32 %v990_v14, %v756_v15 }
  0x28   :  { %310 = vmatpush.bf16.msra.mxu1 %v783_v57  ;;  %v732_v23 = vld [vmem:[#allocation6 + $0x10] sm:$0xf0]  ;;  %v738_v24 = vld [vmem:[#allocation6 + $0x8] sm:$0xf]  ;;  %v988_v25 = vld [vmem:[#allocation6 + $0x14] sm:$0xf0]  ;;  %v731_v28 = vor.u32 %v987_v20, %v730_v19 }
  0x29   :  { %324 = vmatpush.bf16.msra.mxu2 %v787_v58  ;;  %338 = vmatpush.bf16.msra.mxu3 %v791_v62  ;;  %v986_v26 = vld [vmem:[#allocation6 + $0xc] sm:$0xf]  ;;  %v740_v27 = vld [vmem:[#allocation6 + $0x18] sm:$0xf0]  ;;  %v735_v29 = vor.u32 %v985_v21, %v732_v23  ;;  %v739_v30 = vor.u32 %v988_v25, %v738_v24  ;;  %v1023_v36 = vld [vmem:[#allocation9 + $0x30] sm:$0xff]  ;;  %s1200_s15 = smov [#allocation11]  }
  0x2a   :  { %v743_v31 = vor.u32 %v986_v26, %v740_v27  ;;  %v1024_v32 = vld [vmem:[#allocation9 + $0x38] sm:$0xff]  ;;  %v1031_v38 = vld [vmem:[#allocation9 + $0x70] sm:$0xff]  ;;  %v1022_v40 = vld [vmem:[#allocation9 + $0x28] sm:$0xff]  ;;  %s707_s16 = sshll.u32 %s1200_s15, 4  ;;  %s709_s19 = sshll.u32 %s1263_s5, 4  ;;  %s708_s16 = int_to_ptr.vmem [resolvable:$true] %s707_s16  ;;  %s710_s19 = int_to_ptr.hbm [resolvable:$true] %s709_s19 }
  0x2b   :  { %297 = vmatpush.bf16.msra.mxu0 %v763_v4  ;;  %v984_v33 = vld [vmem:[#allocation3] sm:$0xff]  ;;  %v1030_v42 = vld [vmem:[#allocation9 + $0x68] sm:$0xff]  ;;  %v1021_v44 = vld [vmem:[#allocation9 + $0x20] sm:$0xff] }
  0x2c   :  { %311 = vmatpush.bf16.msra.mxu1 %v767_v5  ;;  %v1032_v34 = vld [vmem:[#allocation9 + $0x78] sm:$0xff]  ;;  %v1039_v39 = vld [vmem:[#allocation9 + $0xb0] sm:$0xff]  ;;  %v1038_v43 = vld [vmem:[#allocation9 + $0xa8] sm:$0xff] }
  0x2d   :  { %325 = vmatpush.bf16.msra.mxu2 %v771_v6  ;;  %339 = vmatpush.bf16.msra.mxu3 %v775_v10  ;;  %v1040_v35 = vld [vmem:[#allocation9 + $0xb8] sm:$0xff]  ;;  %v1047_v41 = vld [vmem:[#allocation9 + $0xf0] sm:$0xff]  ;;  %v1046_v45 = vld [vmem:[#allocation9 + $0xe8] sm:$0xff] }
  0x2e   :  { %v1048_v37 = vld [vmem:[#allocation9 + $0xf8] sm:$0xff]  ;;  %v1029_v46 = vld [vmem:[#allocation9 + $0x60] sm:$0xff]  ;;  %v1019_v51 = vld [vmem:[#allocation9 + $0x10] sm:$0xff] }
  0x2f   :  { %298 = vmatpush.bf16.msra.mxu0 %v747_v16  ;;  %v1020_v47 = vld [vmem:[#allocation9 + $0x18] sm:$0xff]  ;;  %v1037_v49 = vld [vmem:[#allocation9 + $0xa0] sm:$0xff]  ;;  %v1027_v52 = vld [vmem:[#allocation9 + $0x50] sm:$0xff] }
  0x30   :  { %312 = vmatpush.bf16.msra.mxu1 %v751_v17  ;;  %v1028_v48 = vld [vmem:[#allocation9 + $0x58] sm:$0xff]  ;;  %v1045_v50 = vld [vmem:[#allocation9 + $0xe0] sm:$0xff]  ;;  %v1018_v55 = vld [vmem:[#allocation9 + $0x8] sm:$0xff] }
  0x31   :  { %326 = vmatpush.bf16.msra.mxu2 %v755_v18  ;;  %340 = vmatpush.bf16.msra.mxu3 %v759_v22  ;;  %v1036_v53 = vld [vmem:[#allocation9 + $0x98] sm:$0xff]  ;;  %v1026_v56 = vld [vmem:[#allocation9 + $0x48] sm:$0xff]  ;;  %v1035_v57 = vld [vmem:[#allocation9 + $0x90] sm:$0xff] }
  0x32   :  { %v1044_v54 = vld [vmem:[#allocation9 + $0xd8] sm:$0xff]  ;;  %v1043_v58 = vld [vmem:[#allocation9 + $0xd0] sm:$0xff]  ;;  %v1017_v59 = vld [vmem:[#allocation9] sm:$0xff] }
  0x33   :  { %299 = vmatpush.bf16.msra.mxu0 %v731_v28  ;;  %v1025_v60 = vld [vmem:[#allocation9 + $0x40] sm:$0xff]  ;;  %v1034_v61 = vld [vmem:[#allocation9 + $0x88] sm:$0xff]  ;;  %v116_v1 = vld [vmem:[#allocation8] sm:$0xf] }
  0x34   :  { %313 = vmatpush.bf16.msra.mxu1 %v735_v29  ;;  %v1042_v62 = vld [vmem:[#allocation9 + $0xc8] sm:$0xff]  ;;  %v1033_v63 = vld [vmem:[#allocation9 + $0x80] sm:$0xff]  ;;  %v118_v3 = vperm.slane %v116_v1, 0  ;;  %v119_v5 = vperm.slane %v116_v1, 1  ;;  %v120_v15 = vperm.slane %v116_v1, 2  ;;  %v121_v17 = vperm.slane %v116_v1, 3 }
  0x35   :  { %327 = vmatpush.bf16.msra.mxu2 %v739_v30  ;;  %341 = vmatpush.bf16.msra.mxu3 %v743_v31  ;;  %v1041_v0 = vld [vmem:[#allocation9 + $0xc0] sm:$0xff] }
  0x36   :  { %300 = vmatmul.bf16.vlgmr.msra.gmra.mxu0 %v984_v33 }
  0x37   :  { %616 = vmatpush.bf16.msrb.mxu0 %v1024_v32  ;;  %314 = vmatmul.bf16.vlgmr.msra.gmra.mxu1 %v984_v33 }
  0x38   :  { %630 = vmatpush.bf16.msrb.mxu1 %v1032_v34  ;;  %328 = vmatmul.bf16.vlgmr.msra.gmra.mxu2 %v984_v33 }
  0x39   :  { %342 = vmatmul.bf16.vlgmr.msra.gmra.mxu3 %v984_v33  ;;  %644 = vmatpush.bf16.msrb.mxu2 %v1040_v35 }
  0x3a   :  { %658 = vmatpush.bf16.msrb.mxu3 %v1048_v37 }
  0x3b   :  { %617 = vmatpush.bf16.msrb.mxu0 %v1023_v36 }
  0x3c   :  { %631 = vmatpush.bf16.msrb.mxu1 %v1031_v38 }
  0x3d   :  { %645 = vmatpush.bf16.msrb.mxu2 %v1039_v39 }
  0x3e   :  { %659 = vmatpush.bf16.msrb.mxu3 %v1047_v41 }
  0x3f   :  { %618 = vmatpush.bf16.msrb.mxu0 %v1022_v40 }
  0x40   :  { %632 = vmatpush.bf16.msrb.mxu1 %v1030_v42 }
  0x41   :  { %646 = vmatpush.bf16.msrb.mxu2 %v1038_v43 }
  0x42   :  { %660 = vmatpush.bf16.msrb.mxu3 %v1046_v45  ;;  %v1063_v45 = vld [vmem:[%s1262_s4] ss:$0 sm:$0xff] }
  0x43   :  { %619 = vmatpush.bf16.msrb.mxu0 %v1021_v44 }
  0x44   :  { %633 = vmatpush.bf16.msrb.mxu1 %v1029_v46 }
  0x45   :  { %647 = vmatpush.bf16.msrb.mxu2 %v1037_v49 }
  0x46   :  { %661 = vmatpush.bf16.msrb.mxu3 %v1045_v50 }
  0x47   :  { %620 = vmatpush.bf16.msrb.mxu0 %v1020_v47 }
  0x48   :  { %634 = vmatpush.bf16.msrb.mxu1 %v1028_v48 }
  0x49   :  { %648 = vmatpush.bf16.msrb.mxu2 %v1036_v53 }
  0x4a   :  { %662 = vmatpush.bf16.msrb.mxu3 %v1044_v54 }
  0x4b   :  { %621 = vmatpush.bf16.msrb.mxu0 %v1019_v51 }
  0x4c   :  { %635 = vmatpush.bf16.msrb.mxu1 %v1027_v52 }
  0x4d   :  { %649 = vmatpush.bf16.msrb.mxu2 %v1035_v57 }
  0x4e   :  { %663 = vmatpush.bf16.msrb.mxu3 %v1043_v58 }
  0x4f   :  { %622 = vmatpush.bf16.msrb.mxu0 %v1018_v55 }
  0x50   :  { %636 = vmatpush.bf16.msrb.mxu1 %v1026_v56 }
  0x51   :  { %650 = vmatpush.bf16.msrb.mxu2 %v1034_v61 }
  0x52   :  { %664 = vmatpush.bf16.msrb.mxu3 %v1042_v62 }
  0x53   :  { %623 = vmatpush.bf16.msrb.mxu0 %v1017_v59 }
  0x54   :  { %637 = vmatpush.bf16.msrb.mxu1 %v1025_v60 }
  0x55   :  { %651 = vmatpush.bf16.msrb.mxu2 %v1033_v63 }
  0x56   :  { %665 = vmatpush.bf16.msrb.mxu3 %v1041_v0 }
  0xb3   :  { %v301_v2 = vpop.f32.mrf.mxu0 }
  0xb4   :  { %v315_v4 = vpop.f32.mrf.mxu1  ;;  %v302_v6 = vadd.f32 %v301_v2, %v118_v3 }
  0xb5   :  { %v316_v7 = vadd.f32 %v315_v4, %v119_v5 }
  0xb6   :  { %v348_v11 = vmax.f32 %v302_v6, 0.0 }
  0xb7   :  { %v349_v14 = vmax.f32 %v316_v7, 0.0 }
  0xbb   :  { %v329_v8 = vpop.f32.mrf.mxu2  ;;  %v303_v10 = vpop.f32.mrf.mxu0 }
  0xbc   :  { %v343_v9 = vpop.f32.mrf.mxu3  ;;  %v304_v12 = vadd.f32 %v303_v10, %v118_v3  ;;  %v317_v13 = vpop.f32.mrf.mxu1  ;;  %v330_v21 = vadd.f32 %v329_v8, %v120_v15 }
  0xbd   :  { %v318_v16 = vadd.f32 %v317_v13, %v119_v5  ;;  %v344_v23 = vadd.f32 %v343_v9, %v121_v17 }
  0xbe   :  { %v352_v18 = vmax.f32 %v304_v12, 0.0  ;;  %v350_v28 = vmax.f32 %v330_v21, 0.0 }
  0xbf   :  { %v353_v19 = vmax.f32 %v318_v16, 0.0  ;;  %v351_v30 = vmax.f32 %v344_v23, 0.0 }
  0xc0   :  { %v356_v20 = vpack.c.bf16 %v352_v18, %v348_v11 }
  0xc1   :  { %v357_v22 = vpack.c.bf16 %v353_v19, %v349_v14 }
  0xc2   :  { %624 = vmatmul.bf16.vlgmr.msrb.gmra.mxu0 %v356_v20 }
  0xc3   :  { %v331_v24 = vpop.f32.mrf.mxu2  ;;  %638 = vmatmul.bf16.vlgmr.msrb.gmra.mxu1 %v357_v22 }
  0xc4   :  { %v332_v25 = vadd.f32 %v331_v24, %v120_v15  ;;  %v345_v26 = vpop.f32.mrf.mxu3 }
  0xc5   :  { %v346_v27 = vadd.f32 %v345_v26, %v121_v17 }
  0xc6   :  { %v354_v29 = vmax.f32 %v332_v25, 0.0 }
  0xc7   :  { %v355_v31 = vmax.f32 %v346_v27, 0.0 }
  0xc8   :  { %v358_v32 = vpack.c.bf16 %v354_v29, %v350_v28 }
  0xc9   :  { %v359_v33 = vpack.c.bf16 %v355_v31, %v351_v30 }
  0xca   :  { %652 = vmatmul.bf16.vlgmr.msrb.gmra.mxu2 %v358_v32 }
  0xcb   :  { %666 = vmatmul.bf16.vlgmr.msrb.gmra.mxu3 %v359_v33 }
 0x13f   :  { %v625_v34 = vpop.f32.mrf.mxu0 }
 0x140   :  { %v639_v35 = vpop.f32.mrf.mxu1 }
 0x141   :  { %v640_v38 = vadd.f32 %v639_v35, %v625_v34 }
 0x147   :  { %v627_v39 = vpop.f32.mrf.mxu0 }
 0x148   :  { %v641_v40 = vpop.f32.mrf.mxu1 }
 0x149   :  { %v642_v42 = vadd.f32 %v641_v40, %v627_v39 }
 0x14d   :  { %v653_v36 = vpop.f32.mrf.mxu2 }
 0x14e   :  { %v667_v37 = vpop.f32.mrf.mxu3  ;;  %v654_v41 = vadd.f32 %v653_v36, %v640_v38 }
 0x150   :  { %v668_v44 = vadd.f32 %v667_v37, %v654_v41 }
 0x152   :  { %v697_v49 = vadd.f32 %v1063_v45, %v668_v44 }
 0x155   :  { %v655_v43 = vpop.f32.mrf.mxu2 }
 0x156   :  { %v656_v46 = vadd.f32 %v655_v43, %v642_v42  ;;  %v669_v47 = vpop.f32.mrf.mxu3 }
 0x158   :  { %v670_v48 = vadd.f32 %v669_v47, %v656_v46 }
 0x15a   :  { %v698_v50 = vadd.f32 %v1063_v45, %v670_v48 }
 0x15c   :  { %v1052_v51 = vpack.c.bf16 %v698_v50, %v697_v49 }
 0x15e   :  { %1053 = vst [vmem:[#allocation11] sm:$0xff] %v1052_v51  }
 0x15f   :  { %715 = dma.vmem_to_hbm [thread:$0]  %s708_s16, 128, %s710_s19, [#allocation5], %s1196_s30, %s1196_s30, %s1197_s6  }
 0x160   :  { %1190 = dma.done.wait [#allocation5], 128  }
 0x161   :  { %1191 = vsyncadd [#allocation5], 4294967168 }
 0x162   :  { %720 = vsyncpa [#allocation4], 1 }
 0x163   :  { %721 = vsyncpa [#allocation7], 1 }
 0x164   :  { %722 = vsyncpa [#allocation10], 1 }
 0x165   :  { %723 = vsyncpa [#allocation5], 1 }

</bundles_post_ra>
